<compile_context>
chip_gen: v7x
topology: tpu7x:2x2x1
jax: 0.10.0
libtpu: 0.0.40
codegen_flags: <defaults>
</compile_context>

<pallas_src>
import functools
import math

import jax
import jax.numpy as jnp
from jax.experimental import pallas as pl
from jax.experimental.pallas import tpu as pltpu


def _rsoftmax_kernel(x_ref, o_ref, *, groups, radix, r, fold):
    # x_ref / o_ref: (TB, fold * C) with C = groups * radix * r.
    # Each lane row holds `fold` independent batch sub-rows of length C.
    # Input sub-rows are cardinal-major [g, k, j]; output sub-rows are
    # radix-major [k, g, j].  groups/radix/fold are small static ints, so
    # everything is fully unrolled into VPU elementwise work.
    C = groups * radix * r
    x = x_ref[...].astype(jnp.float32)
    # Direct per-plane stores are lane-aligned only when r is a lane multiple
    # (folding only triggers when C % 128 != 0, i.e. never together with this).
    direct = (r % 128 == 0) and (fold == 1)
    out_planes = [None] * (fold * groups * radix)
    for f in range(fold):
        row0 = f * C
        for g in range(groups):
            base = row0 + g * radix * r
            planes = [x[:, base + k * r: base + (k + 1) * r] for k in range(radix)]
            # Unrolled, numerically-stable softmax across the radix planes.
            m = planes[0]
            for p in planes[1:]:
                m = jnp.maximum(m, p)
            es = [jnp.exp(p - m) for p in planes]
            s = es[0]
            for e in es[1:]:
                s = s + e
            inv = 1.0 / s  # exact; kernel is HBM-bound so this is free.
            for k in range(radix):
                plane = (es[k] * inv).astype(o_ref.dtype)
                if direct:
                    off = row0 + (k * groups + g) * r
                    o_ref[:, off:off + r] = plane
                else:
                    out_planes[f * groups * radix + k * groups + g] = plane
    if not direct:
        # One lane-dense, full-width store (planes already in output dtype).
        o_ref[...] = jnp.concatenate(out_planes, axis=-1)


def _sublane_multiple(dtype):
    itemsize = jnp.dtype(dtype).itemsize
    if itemsize >= 4:
        return 8
    if itemsize == 2:
        return 16
    return 32


def _pick_batch_tile(B, row_bytes, sub, target_bytes=2 * 1024 * 1024):
    # ~2 MiB input per grid step (streaming kernels only reach ~85% of the HBM
    # roofline at 1-4 MiB blocks); double-buffered in+out stays well under the
    # scoped VMEM default on v5e/v6e/v7x.
    tb = max(sub, target_bytes // max(row_bytes, 1))
    if tb >= B:
        return B  # single grid step: small inputs are launch-bound anyway.
    tb = max(sub, (tb // sub) * sub)
    steps = -(-B // tb)
    if steps % 2 == 1:
        # Prefer an even step count so both v7x TensorCores stay balanced; on
        # single-TC v5e/v6e this only shrinks blocks slightly.
        want = -(-B // (steps + 1))
        tb2 = -(-want // sub) * sub
        if tb2 >= sub and (-(-B // tb2)) % 2 == 0:
            tb = tb2
    return min(tb, B)


def rsoftmax(x, groups: int = 1, radix: int = 2):
    """Pallas implementation of rSoftMax.forward.

    x: (B, C, 1, 1) or (B, C); C must be divisible by groups*radix.
    Returns (B, C, 1, 1) matching PyTorch output ordering (radix-major).
    """
    B = x.shape[0]
    flat = x.reshape(B, -1)                       # cardinal-major; free reshape
    C = flat.shape[1]
    assert C % (groups * radix) == 0
    r = C // (groups * radix)

    # Lane-dense folding: pack `fold` batch rows into one lane row so the last
    # dim is a multiple of 128 (avoids masked vst.msk partial stores).
    fold = 1
    if C % 128 != 0:
        k = 128 // math.gcd(C, 128)
        if k > 1 and B % k == 0:
            fold = k
    B_eff = B // fold
    C_eff = fold * C
    flat = flat.reshape(B_eff, C_eff)             # still free (contiguous)

    sub = _sublane_multiple(flat.dtype)
    tb = _pick_batch_tile(B_eff, C_eff * flat.dtype.itemsize, sub)
    grid = (pl.cdiv(B_eff, tb),)

    kernel = functools.partial(
        _rsoftmax_kernel, groups=groups, radix=radix, r=r, fold=fold)
    out = pl.pallas_call(
        kernel,
        out_shape=jax.ShapeDtypeStruct((B_eff, C_eff), x.dtype),
        grid_spec=pltpu.PrefetchScalarGridSpec(
            num_scalar_prefetch=0,
            grid=grid,
            in_specs=[pl.BlockSpec((tb, C_eff), lambda i: (i, 0))],
            out_specs=pl.BlockSpec((tb, C_eff), lambda i: (i, 0)),
        ),
        compiler_params=pltpu.CompilerParams(
            dimension_semantics=("parallel",)),
    )(flat)

    # Unfold and view(B, -1, 1, 1): kernel output is already radix-major.
    return out.reshape(B, -1, 1, 1)


if __name__ == "__main__":
    key = jax.random.PRNGKey(0)
    k1, k2 = jax.random.split(key)

    def ref_rsoftmax(x, groups, radix):
        B = x.shape[0]
        t = x.reshape(B, groups, radix, -1).transpose(0, 2, 1, 3)
        t = jax.nn.softmax(t, axis=1)
        return t.reshape(B, -1, 1, 1)

    # Case 1: ResNeSt-style, C = 128 (lane-aligned), groups=2, radix=2, r=32.
    B, groups, radix, rchan = 2, 2, 2, 32
    C = groups * radix * rchan
    x1 = jax.random.normal(k1, (B, C, 1, 1), dtype=jnp.float32)
    out1 = jax.block_until_ready(rsoftmax(x1, groups=groups, radix=radix))
    ref1 = ref_rsoftmax(x1, groups, radix)
    assert out1.shape == (B, C, 1, 1)
    assert jnp.allclose(out1, ref1, atol=1e-5, rtol=1e-5)

    # Case 2: C = 64 (< 128) exercises the lane-dense row-folding path.
    B2, g2, rad2, rc2 = 4, 1, 2, 32
    C2 = g2 * rad2 * rc2
    x2 = jax.random.normal(k2, (B2, C2, 1, 1), dtype=jnp.float32)
    out2 = jax.block_until_ready(rsoftmax(x2, groups=g2, radix=rad2))
    ref2 = ref_rsoftmax(x2, g2, rad2)
    assert out2.shape == (B2, C2, 1, 1)
    assert jnp.allclose(out2, ref2, atol=1e-5, rtol=1e-5)

    print("KERNEL_OK")
</pallas_src>

<mosaic_0001>
module attributes {stable_mosaic.version = 11 : i64} {
  func.func @_rsoftmax_kernel(%arg0: i32, %arg1: memref<2x128xf32, #tpu.memory_space<vmem>>, %arg2: memref<2x128xf32, #tpu.memory_space<vmem>>) attributes {dimension_semantics = [#tpu.dimension_semantics<parallel>], iteration_bounds = array<i64: 1>, scalar_prefetch = 0 : i64, scratch_operands = 0 : i64, tpu.core_type = #tpu.core_type<tc>, window_params = [{transform_indices = @transform_0, window_bounds = array<i64: 2, 128>}, {transform_indices = @transform_1, window_bounds = array<i64: 2, 128>}]} {
    %c0 = arith.constant 0 : index
    %c0_0 = arith.constant 0 : index
    %0 = vector.load %arg1[%c0, %c0_0] : memref<2x128xf32, #tpu.memory_space<vmem>>, vector<2x128xf32>
    %1 = vector.extract_strided_slice %0 {offsets = [0, 0], sizes = [2, 32], strides = [1, 1]} : vector<2x128xf32> to vector<2x32xf32>
    %2 = vector.extract_strided_slice %0 {offsets = [0, 32], sizes = [2, 32], strides = [1, 1]} : vector<2x128xf32> to vector<2x32xf32>
    %3 = arith.maximumf %1, %2 : vector<2x32xf32>
    %4 = arith.subf %1, %3 : vector<2x32xf32>
    %5 = math.exp %4 : vector<2x32xf32>
    %6 = arith.subf %2, %3 : vector<2x32xf32>
    %7 = math.exp %6 : vector<2x32xf32>
    %8 = arith.addf %5, %7 : vector<2x32xf32>
    %cst = arith.constant 1.000000e+00 : f32
    %9 = vector.broadcast %cst : f32 to vector<2x32xf32>
    %10 = arith.divf %9, %8 : vector<2x32xf32>
    %11 = arith.mulf %5, %10 : vector<2x32xf32>
    %12 = arith.mulf %7, %10 : vector<2x32xf32>
    %13 = vector.extract_strided_slice %0 {offsets = [0, 64], sizes = [2, 32], strides = [1, 1]} : vector<2x128xf32> to vector<2x32xf32>
    %14 = vector.extract_strided_slice %0 {offsets = [0, 96], sizes = [2, 32], strides = [1, 1]} : vector<2x128xf32> to vector<2x32xf32>
    %15 = arith.maximumf %13, %14 : vector<2x32xf32>
    %16 = arith.subf %13, %15 : vector<2x32xf32>
    %17 = math.exp %16 : vector<2x32xf32>
    %18 = arith.subf %14, %15 : vector<2x32xf32>
    %19 = math.exp %18 : vector<2x32xf32>
    %20 = arith.addf %17, %19 : vector<2x32xf32>
    %cst_1 = arith.constant 1.000000e+00 : f32
    %21 = vector.broadcast %cst_1 : f32 to vector<2x32xf32>
    %22 = arith.divf %21, %20 : vector<2x32xf32>
    %23 = arith.mulf %17, %22 : vector<2x32xf32>
    %24 = arith.mulf %19, %22 : vector<2x32xf32>
    %25 = tpu.concatenate %11, %23, %12, %24 in 1 : vector<2x32xf32>, vector<2x32xf32>, vector<2x32xf32>, vector<2x32xf32> -> vector<2x128xf32>
    %c0_2 = arith.constant 0 : index
    %c0_3 = arith.constant 0 : index
    %26 = vector.load %arg2[%c0_2, %c0_3] : memref<2x128xf32, #tpu.memory_space<vmem>>, vector<2x128xf32>
    tpu.vector_store %arg2[%c0_2, %c0_3], %25 {strides = array<i32>} : memref<2x128xf32, #tpu.memory_space<vmem>>, vector<2x128xf32>,
    return
  }
  func.func @transform_0(%arg0: i32) -> (i32, i32) {
    %c0_i32 = arith.constant 0 : i32
    %c0_i32_0 = arith.constant 0 : i32
    return %arg0, %c0_i32 : i32, i32
  }
  func.func @transform_1(%arg0: i32) -> (i32, i32) {
    %c0_i32 = arith.constant 0 : i32
    %c0_i32_0 = arith.constant 0 : i32
    return %arg0, %c0_i32 : i32, i32
  }
}

</mosaic_0001>

<bundles_post_ra>
// kernel: tpu_custom_call.1
= control target key start
LH: loop header
LB: loop body
LE: loop exit
PB: predicated region body
PF: predicated region fallthrough
CT: control target
= control target key end

     0   :  { %6 = vsyncpa [#allocation3], 0  ;;  %s176_s0 = inlined_call_operand.hbm [shape: f32[2,128], index: 0, kind: input, shape index: {}]   ;;  %s177_s1 = inlined_call_operand.hbm [shape: f32[2,128], index: 1, kind: output, shape index: {}]  }
   0x1   :  { %7 = vsyncpa [#allocation4], 0  ;;  %s138_s6 = smov [#allocation2]   ;;  %s90_s10 = scalar_lea.hbm %s176_s0, 32 }
   0x2   :  { %s14_s7 = sshll.u32 %s138_s6, 4  ;;  %p91_p0 = scmp.ne.s32.totalorder %s176_s0, %s90_s10  ;;  %s15_s7 = int_to_ptr.vmem [resolvable:$true] %s14_s7 }
   0x3   :  { %p94_p1 = scmp.lt.u32.totalorder %s90_s10, %s176_s0 }
   0x5   :  { %p96_p2 = pnand %p94_p1, %p91_p0 }
   0x7   :  { %99 = shalt.err (!%p96_p2)
}
   0x8   :  { %s100_s15 = scalar_lea.vmem %s15_s7, 32  ;;  %p105_p4 = scmp.lt.s32.totalorder %s15_s7, %s15_s7 }
   0x9   :  { %p101_p3 = scmp.ne.s32.totalorder %s15_s7, %s100_s15  ;;  %p106_p5 = scmp.lt.s32.totalorder %s100_s15, %s100_s15 }
   0xb   :  { %p107_p6 = por %p106_p5, %p105_p4 }
   0xd   :  { %p108_p7 = pnand %p107_p6, %p101_p3 }
   0xf   :  { %111 = shalt.err (!%p108_p7)
}
  0x10   :  { %17 = dma.hbm_to_vmem [thread:$0]  %s176_s0, 32, %s15_s7, [#allocation3]  }
  0x11   :  { %134 = dma.done.wait [#allocation3], 32  }
  0x12   :  { %135 = vsyncadd [#allocation3], 4294967264  ;;  %v21_v0 = vld [vmem:[#allocation2] sm:$0x3]  ;;  %s139_s18 = smov 96   ;;  %s140_s19 = smov 32  }
  0x13   :  { %23 = vrot.lane.b32.xlu0 %v21_v0, %s139_s18  ;;  %vm58_vm0 = vcmask 261120   ;;  %vm60_vm1 = vcmask 523264   ;;  %s141_s0 = smov [#allocation5]   ;;  %vm62_vm2 = vcmask 785408  }
  0x14   :  { %s71_s20 = sshll.u32 %s141_s0, 4  ;;  %s72_s20 = int_to_ptr.vmem [resolvable:$true] %s71_s20 }
  0x15   :  { %s112_s21 = scalar_lea.vmem %s72_s20, 32  ;;  %p117_p9 = scmp.lt.s32.totalorder %s72_s20, %s72_s20 }
  0x16   :  { %p113_p8 = scmp.ne.s32.totalorder %s72_s20, %s112_s21  ;;  %p118_p10 = scmp.lt.s32.totalorder %s112_s21, %s112_s21 }
  0x18   :  { %p119_p11 = por %p118_p10, %p117_p9 }
  0x1a   :  { %p120_p12 = pnand %p119_p11, %p113_p8 }
  0x85   :  { %v24_v1 = vpop.permute.xlu0 %23 }
  0x86   :  { %v26_v2 = vmax.f32 %v21_v0, %v24_v1 }
  0x88   :  { %31 = vrot.lane.b32.xlu0 %v26_v2, %s140_s19  ;;  %v27_v7 = vsub.f32 %v21_v0, %v26_v2 }
  0x8a   :  { %v28_v8 = vmul.f32 1.442695, %v27_v7 }
  0xfa   :  { %v32_v3 = vpop.permute.xlu0 %31 }
  0xfb   :  { %v34_v4 = vsub.f32 %v21_v0, %v32_v3 }
  0xfd   :  { %v35_v5 = vmul.f32 1.442695, %v34_v4 }
  0xff   :  { %84 = vpow2.f32 %v35_v5 }
 0x100   :  { %86 = vpow2.f32 %v28_v8 }
 0x109   :  { %v85_v6 = vpop.eup %84 }
 0x10a   :  { %38 = vrot.lane.b32.xlu1 %v85_v6, %s139_s18  ;;  %v87_v9 = vpop.eup %86 }
 0x17c   :  { %v39_v10 = vpop.permute.xlu1 %38 }
 0x17d   :  { %v41_v11 = vadd.f32 %v87_v9, %v39_v10 }
 0x17f   :  { %88 = vrcp.f32 %v41_v11 }
 0x189   :  { %v89_v12 = vpop.eup %88 }
 0x18a   :  { %46 = vrot.lane.b32.xlu1 %v89_v12, %s140_s19  ;;  %v44_v13 = vmul.f32 %v89_v12, %v87_v9 }
 0x18c   :  { %51 = vrot.lane.b32.xlu0 %v44_v13, %s139_s18 }
 0x1fc   :  { %v47_v14 = vpop.permute.xlu1 %46 }
 0x1fd   :  { %v49_v15 = vmul.f32 %v85_v6, %v47_v14 }
 0x1fe   :  { %v52_v16 = vpop.permute.xlu0 %51 }
 0x1ff   :  { %55 = vrot.lane.b32.xlu1 %v49_v15, %s140_s19  ;;  %v59_v17 = vsel %vm58_vm0, %v44_v13, %v52_v16 }
 0x271   :  { %v56_v18 = vpop.permute.xlu1 %55 }
 0x272   :  { %v61_v19 = vsel %vm60_vm1, %v59_v17, %v56_v18 }
 0x273   :  { %v63_v20 = vsel %vm62_vm2, %v61_v19, %v49_v15 }
 0x274   :  { %64 = vst [vmem:[#allocation5] sm:$0x3] %v63_v20 }
 0x275   :  { %123 = shalt.err (!%p120_p12)
}
 0x276   :  { %s124_s24 = scalar_lea.hbm %s177_s1, 32 }
 0x277   :  { %p125_p13 = scmp.ne.s32.totalorder %s177_s1, %s124_s24  ;;  %p128_p0 = scmp.lt.u32.totalorder %s124_s24, %s177_s1 }
 0x279   :  { %p130_p1 = pnand %p128_p0, %p125_p13 }
 0x27b   :  { %133 = shalt.err (!%p130_p1)
}
 0x27c   :  { %74 = dma.vmem_to_hbm [thread:$0]  %s72_s20, 32, %s177_s1, [#allocation4]  }
 0x27d   :  { %136 = dma.done.wait [#allocation4], 32  }
 0x27e   :  { %137 = vsyncadd [#allocation4], 4294967264 }
 0x27f   :  { %78 = vsyncpa [#allocation3], 1 }
 0x280   :  { %79 = vsyncpa [#allocation4], 1 }

</bundles_post_ra>
